<compile_context>
chip_gen: v6e
topology: v6e:2x2x1
jax: 0.10.0
libtpu: 0.0.40
codegen_flags: <defaults>
</compile_context>

<pallas_src>
import functools

import jax
import jax.numpy as jnp
from jax.experimental import pallas as pl
from jax.experimental.pallas import tpu as pltpu


# ------------------------------ Pallas kernel ------------------------------ #
def _basic_block_kernel(x_ref, w1_ref, s1_ref, b1_ref, w2_ref, s2_ref, b2_ref,
                        ws_ref, ss_ref, bs_ref, mask_ref, out_ref, o1p_ref, *,
                        stride, Wp, Jout, LPAD, has_proj):
    planes = w2_ref.shape[1]
    Cin = x_ref.shape[1] // 3
    L_scr = o1p_ref.shape[1]

    # Zero only the halo margins of the scratch (128-aligned strips); the
    # interior [LPAD, LPAD+Jout) is fully overwritten by the masked y1 store.
    # Done every grid step so each TensorCore's private scratch is valid.
    o1p_ref[:, :LPAD] = jnp.zeros((planes, LPAD), o1p_ref.dtype)
    o1p_ref[:, LPAD + Jout:L_scr] = jnp.zeros((planes, L_scr - LPAD - Jout),
                                              o1p_ref.dtype)

    mask = mask_ref[...]                                   # (1, Jout) validity

    # ---- conv1 (3x3, stride) + BN1 + ReLU: 3 kh-stacked matmuls, K = 3*Cin ----
    acc1 = jnp.zeros((planes, Jout), jnp.float32)
    for kw in range(3):
        p, q = kw % stride, kw // stride
        slab = x_ref[p, :, q:q + Jout]                     # (3*Cin, Jout) bf16
        acc1 = acc1 + jnp.dot(w1_ref[kw], slab,
                              preferred_element_type=jnp.float32)
    y1 = jnp.maximum(acc1 * s1_ref[...] + b1_ref[...], 0.0) * mask
    o1p_ref[:, LPAD:LPAD + Jout] = y1.astype(o1p_ref.dtype)   # lane-dense store

    # ---- conv2 (3x3, stride 1) + BN2, reading the padded VMEM scratch ----
    acc2 = jnp.zeros((planes, Jout), jnp.float32)
    for kh in range(3):
        for kw in range(3):
            start = LPAD + kh * Wp + kw - (Wp + 1)
            slab = o1p_ref[:, start:start + Jout]          # (planes, Jout) bf16
            acc2 = acc2 + jnp.dot(w2_ref[kh * 3 + kw], slab,
                                  preferred_element_type=jnp.float32)
    y2 = acc2 * s2_ref[...] + b2_ref[...]

    # ---- shortcut (identity, or fused 1x1 conv + BN projection) ----
    # The kh=1 (centre-row) block is block 0 of the stacked input, so the
    # shortcut only needs the in-row +1 shift.
    p_sc, q_sc = 1 % stride, 1 // stride
    x_sc = x_ref[p_sc, :Cin, q_sc:q_sc + Jout]             # (Cin, Jout) bf16
    if has_proj:
        sc = jnp.dot(ws_ref[...], x_sc, preferred_element_type=jnp.float32)
        sc = sc * ss_ref[...] + bs_ref[...]
    else:
        sc = x_sc.astype(jnp.float32)

    out_ref[...] = jnp.maximum(y2 + sc, 0.0).astype(out_ref.dtype)


# ------------------------------- JAX wrapper -------------------------------- #
def _fold_bn(bn_params, eps=1e-5):
    gamma, beta, mean, var = bn_params
    scale = gamma / jnp.sqrt(var + eps)
    return scale, beta - mean * scale


def basic_block_forward(x, params, stride):
    """Inference BasicBlock.forward.  x: (N, Cin, H, W) f32 -> (N, P, Ho, Wo) bf16."""
    N, Cin, H, W = x.shape
    planes = params["w1"].shape[0]
    pad = 1
    Ho = (H + 2 * pad - 3) // stride + 1
    Wo = (W + 2 * pad - 3) // stride + 1
    Hp, Wp = H + 2 * pad, W + 2 * pad

    rup = lambda v, m: ((v + m - 1) // m) * m
    J = (Ho - 1) * Wp + Wo          # exact flattened output extent (row pitch Wp)
    Jout = rup(J, 128)              # lane-dense output / scratch interior width
    LPAD = rup(Wp + 1, 128)         # 128-aligned left halo margin in scratch
    RPAD = rup(Wp + 1, 128)         # 128-aligned right halo margin
    L_scr = LPAD + Jout + RPAD
    L_ph = Jout + 128               # per-phase input length (covers kw shifts)
    cdt = jnp.bfloat16

    KH = (1, 0, 2)                  # kh block order: centre row first so the
                                    # shortcut reads sublanes [0:Cin] of block 0

    # Pad + flatten the input, then build the kh-stacked / stride-phase-split
    # layout in one shot: xstk[n, p, kh_blk*Cin + c, j] = xpad[n, c, flat = kh*Wp + p + stride*j].
    xp = jnp.pad(x, ((0, 0), (0, 0), (pad, pad), (pad, pad)))
    xflat = xp.reshape(N, Cin, Hp * Wp)
    L_pad = max(Hp * Wp, 2 * Wp + (stride - 1) + stride * L_ph)
    xflat = jnp.pad(xflat, ((0, 0), (0, 0), (0, L_pad - Hp * Wp)))
    phases = []
    for p in range(stride):
        blocks = [xflat[:, :, kh * Wp + p: kh * Wp + p + stride * L_ph: stride]
                  for kh in KH]
        phases.append(jnp.concatenate(blocks, axis=1))          # (N, 3*Cin, L_ph)
    xstk = jnp.stack(phases, axis=1).astype(cdt)                # (N, stride, 3*Cin, L_ph)

    # Folded BN; kw-major / kh-stacked conv1 weights; tap-major conv2 weights.
    s1, b1 = _fold_bn(params["bn1"])
    s2, b2 = _fold_bn(params["bn2"])
    w1 = params["w1"]                                            # (planes, Cin, 3, 3)
    w1_stk = jnp.concatenate([w1[:, :, kh, :] for kh in KH], axis=1)  # (planes, 3*Cin, 3)
    w1_stk = jnp.transpose(w1_stk, (2, 0, 1)).astype(cdt)        # (3, planes, 3*Cin)
    w2 = jnp.transpose(params["w2"], (2, 3, 0, 1)).reshape(9, planes, planes).astype(cdt)

    has_proj = (stride != 1) or (Cin != planes)
    if has_proj:
        ws = params["ws"][:, :, 0, 0].astype(cdt)                # (planes, Cin)
        ss, bs = _fold_bn(params["bns"])
    else:  # unused dummies (identity shortcut)
        ws = jnp.zeros((planes, Cin), cdt)
        ss = jnp.zeros((planes,), jnp.float32)
        bs = jnp.zeros((planes,), jnp.float32)

    # Validity mask over the lane-dense flattened layout (zeros the inter-row
    # slack columns and the [J, Jout) tail, which double as conv2's zero pad).
    cols = jnp.arange(Jout)
    mask = ((cols % Wp < Wo) & (cols < J)).astype(jnp.float32).reshape(1, Jout)

    def c2(v):
        return v.reshape(planes, 1).astype(jnp.float32)

    kernel = functools.partial(_basic_block_kernel, stride=stride, Wp=Wp,
                               Jout=Jout, LPAD=LPAD, has_proj=has_proj)

    out_flat = pl.pallas_call(
        kernel,
        out_shape=jax.ShapeDtypeStruct((N, planes, Jout), cdt),
        grid=(N,),
        in_specs=[
            pl.BlockSpec((None, stride, 3 * Cin, L_ph), lambda n: (n, 0, 0, 0)),
            pl.BlockSpec((3, planes, 3 * Cin), lambda n: (0, 0, 0)),
            pl.BlockSpec((planes, 1), lambda n: (0, 0)),
            pl.BlockSpec((planes, 1), lambda n: (0, 0)),
            pl.BlockSpec((9, planes, planes), lambda n: (0, 0, 0)),
            pl.BlockSpec((planes, 1), lambda n: (0, 0)),
            pl.BlockSpec((planes, 1), lambda n: (0, 0)),
            pl.BlockSpec((planes, Cin), lambda n: (0, 0)),
            pl.BlockSpec((planes, 1), lambda n: (0, 0)),
            pl.BlockSpec((planes, 1), lambda n: (0, 0)),
            pl.BlockSpec((1, Jout), lambda n: (0, 0)),
        ],
        out_specs=pl.BlockSpec((None, planes, Jout), lambda n: (n, 0, 0)),
        scratch_shapes=[pltpu.VMEM((planes, L_scr), cdt)],
        compiler_params=pltpu.CompilerParams(dimension_semantics=("parallel",)),
    )(xstk, w1_stk, c2(s1), c2(b1), w2, c2(s2), c2(b2), ws, c2(ss), c2(bs), mask)

    # Lane-dense flattened bf16 -> NCHW (a real consumer would keep the
    # flattened bf16 layout and feed the next fused block directly).
    total = Ho * Wp
    out = out_flat
    if Jout < total:
        out = jnp.pad(out, ((0, 0), (0, 0), (0, total - Jout)))
    out = out[:, :, :total].reshape(N, planes, Ho, Wp)[:, :, :, :Wo]
    return out


# ------------------------- reference (mirrors bf16) ------------------------- #
def ref_forward(x, params, stride, eps=1e-5):
    cdt = jnp.bfloat16
    dn = ("NCHW", "OIHW", "NCHW")

    def conv(v, w, s, pad):
        return jax.lax.conv_general_dilated(
            v.astype(cdt), w.astype(cdt), (s, s), [(pad, pad), (pad, pad)],
            dimension_numbers=dn, preferred_element_type=jnp.float32)

    def bn(v, p):
        g, b, m, var = p
        sc = g / jnp.sqrt(var + eps)
        bi = b - m * sc
        return v * sc[None, :, None, None] + bi[None, :, None, None]

    out1 = jax.nn.relu(bn(conv(x, params["w1"], stride, 1), params["bn1"]))
    out = bn(conv(out1, params["w2"], 1, 1), params["bn2"])
    Cin, planes = x.shape[1], params["w1"].shape[0]
    if stride != 1 or Cin != planes:
        sc = bn(conv(x, params["ws"], stride, 0), params["bns"])
    else:
        sc = x.astype(cdt).astype(jnp.float32)
    return jax.nn.relu(out + sc)


# ----------------------------------- main ----------------------------------- #
if __name__ == "__main__":
    key = jax.random.PRNGKey(0)
    keys = jax.random.split(key, 20)

    def bn_init(k, c):
        k1, k2, k3, k4 = jax.random.split(k, 4)
        gamma = jax.random.uniform(k1, (c,), jnp.float32, 0.5, 1.5)
        beta = 0.1 * jax.random.normal(k2, (c,), jnp.float32)
        mean = 0.1 * jax.random.normal(k3, (c,), jnp.float32)
        var = jax.random.uniform(k4, (c,), jnp.float32, 0.5, 1.5)
        return (gamma, beta, mean, var)

    def make_params(ks, in_planes, planes, stride):
        p = {
            "w1": 0.2 * jax.random.normal(ks[0], (planes, in_planes, 3, 3), jnp.float32),
            "bn1": bn_init(ks[1], planes),
            "w2": 0.2 * jax.random.normal(ks[2], (planes, planes, 3, 3), jnp.float32),
            "bn2": bn_init(ks[3], planes),
        }
        if stride != 1 or in_planes != planes:
            p["ws"] = 0.2 * jax.random.normal(ks[4], (planes, in_planes, 1, 1), jnp.float32)
            p["bns"] = bn_init(ks[5], planes)
        return p

    N, H, W = 2, 16, 16
    configs = [
        (4, 8, 1),   # projection shortcut (channel expand), stride 1
        (8, 8, 1),   # identity shortcut
        (4, 8, 2),   # projection shortcut, stride 2
    ]
    for i, (cin, planes, stride) in enumerate(configs):
        ks = jax.random.split(keys[i], 6)
        params = make_params(ks, cin, planes, stride)
        x = jax.random.normal(keys[10 + i], (N, cin, H, W), jnp.float32)

        out = jax.block_until_ready(basic_block_forward(x, params, stride))
        ref = jax.block_until_ready(ref_forward(x, params, stride))

        Ho = (H - 1) // stride + 1
        assert out.shape == (N, planes, Ho, Ho), (out.shape, (N, planes, Ho, Ho))
        out32 = out.astype(jnp.float32)
        err = float(jnp.max(jnp.abs(out32 - ref)))
        # bf16 kernel output -> tolerance covers the final-cast rounding.
        assert jnp.allclose(out32, ref, rtol=2e-2, atol=2e-2), (i, err)

    print("KERNEL_OK")
</pallas_src>

<mosaic_0001>
module attributes {stable_mosaic.version = 11 : i64} {
  func.func @_basic_block_kernel(%arg0: i32, %arg1: memref<1x1x12x512xbf16, #tpu.memory_space<vmem>>, %arg2: memref<3x8x12xbf16, #tpu.memory_space<vmem>>, %arg3: memref<8x1xf32, #tpu.memory_space<vmem>>, %arg4: memref<8x1xf32, #tpu.memory_space<vmem>>, %arg5: memref<9x8x8xbf16, #tpu.memory_space<vmem>>, %arg6: memref<8x1xf32, #tpu.memory_space<vmem>>, %arg7: memref<8x1xf32, #tpu.memory_space<vmem>>, %arg8: memref<8x4xbf16, #tpu.memory_space<vmem>>, %arg9: memref<8x1xf32, #tpu.memory_space<vmem>>, %arg10: memref<8x1xf32, #tpu.memory_space<vmem>>, %arg11: memref<1x384xf32, #tpu.memory_space<vmem>>, %arg12: memref<1x8x384xbf16, #tpu.memory_space<vmem>>, %arg13: memref<8x640xbf16, #tpu.memory_space<vmem>>) attributes {dimension_semantics = [#tpu.dimension_semantics<parallel>], iteration_bounds = array<i64: 2>, scalar_prefetch = 0 : i64, scratch_operands = 1 : i64, tpu.core_type = #tpu.core_type<tc>, window_params = [{transform_indices = @transform_0, window_bounds = array<i64: 1, 1, 12, 512>}, {pipeline_mode = #tpu.pipeline_mode<synchronous>, transform_indices = @transform_1, window_bounds = array<i64: 3, 8, 12>}, {pipeline_mode = #tpu.pipeline_mode<synchronous>, transform_indices = @transform_2, window_bounds = array<i64: 8, 1>}, {pipeline_mode = #tpu.pipeline_mode<synchronous>, transform_indices = @transform_3, window_bounds = array<i64: 8, 1>}, {pipeline_mode = #tpu.pipeline_mode<synchronous>, transform_indices = @transform_4, window_bounds = array<i64: 9, 8, 8>}, {pipeline_mode = #tpu.pipeline_mode<synchronous>, transform_indices = @transform_5, window_bounds = array<i64: 8, 1>}, {pipeline_mode = #tpu.pipeline_mode<synchronous>, transform_indices = @transform_6, window_bounds = array<i64: 8, 1>}, {pipeline_mode = #tpu.pipeline_mode<synchronous>, transform_indices = @transform_7, window_bounds = array<i64: 8, 4>}, {pipeline_mode = #tpu.pipeline_mode<synchronous>, transform_indices = @transform_8, window_bounds = array<i64: 8, 1>}, {pipeline_mode = #tpu.pipeline_mode<synchronous>, transform_indices = @transform_9, window_bounds = array<i64: 8, 1>}, {pipeline_mode = #tpu.pipeline_mode<synchronous>, transform_indices = @transform_10, window_bounds = array<i64: 1, 384>}, {transform_indices = @transform_11, window_bounds = array<i64: 1, 8, 384>}]} {
    %cst = arith.constant 0.000000e+00 : bf16
    %0 = vector.broadcast %cst : bf16 to vector<8x128xbf16>
    %c0 = arith.constant 0 : index
    %c0_0 = arith.constant 0 : index
    %1 = vector.load %arg13[%c0, %c0_0] : memref<8x640xbf16, #tpu.memory_space<vmem>>, vector<8x128xbf16>
    tpu.vector_store %arg13[%c0, %c0_0], %0 {strides = array<i32>} : memref<8x640xbf16, #tpu.memory_space<vmem>>, vector<8x128xbf16>,
    %cst_1 = arith.constant 0.000000e+00 : bf16
    %2 = vector.broadcast %cst_1 : bf16 to vector<8x128xbf16>
    %c0_2 = arith.constant 0 : index
    %c512 = arith.constant 512 : index
    %3 = vector.load %arg13[%c0_2, %c512] : memref<8x640xbf16, #tpu.memory_space<vmem>>, vector<8x128xbf16>
    tpu.vector_store %arg13[%c0_2, %c512], %2 {strides = array<i32>} : memref<8x640xbf16, #tpu.memory_space<vmem>>, vector<8x128xbf16>,
    %c0_3 = arith.constant 0 : index
    %c0_4 = arith.constant 0 : index
    %4 = vector.load %arg11[%c0_3, %c0_4] : memref<1x384xf32, #tpu.memory_space<vmem>>, vector<1x384xf32>
    %cst_5 = arith.constant 0.000000e+00 : f32
    %5 = vector.broadcast %cst_5 : f32 to vector<8x384xf32>
    %c0_6 = arith.constant 0 : index
    %c0_7 = arith.constant 0 : index
    %c0_8 = arith.constant 0 : index
    %c0_9 = arith.constant 0 : index
    %6 = vector.load %arg1[%c0_6, %c0_7, %c0_8, %c0_9] : memref<1x1x12x512xbf16, #tpu.memory_space<vmem>>, vector<1x1x12x384xbf16>
    %7 = vector.shape_cast %6 : vector<1x1x12x384xbf16> to vector<12x384xbf16>
    %c0_10 = arith.constant 0 : index
    %c0_11 = arith.constant 0 : index
    %c0_12 = arith.constant 0 : index
    %8 = vector.load %arg2[%c0_10, %c0_11, %c0_12] : memref<3x8x12xbf16, #tpu.memory_space<vmem>>, vector<1x8x12xbf16>
    %9 = vector.shape_cast %8 : vector<1x8x12xbf16> to vector<8x12xbf16>
    %cst_13 = arith.constant dense<0.000000e+00> : vector<8x384xf32>
    %10 = tpu.matmul %9, %7, %cst_13 {dimension_numbers = #tpu.dot_dimension_numbers<[1], [0], [0], [1], [0, 0, 1, 1], [], []>} : vector<8x12xbf16>, vector<12x384xbf16>, vector<8x384xf32> -> vector<8x384xf32>
    %11 = arith.addf %5, %10 : vector<8x384xf32>
    %c0_14 = arith.constant 0 : index
    %c0_15 = arith.constant 0 : index
    %c0_16 = arith.constant 0 : index
    %c1 = arith.constant 1 : index
    %12 = vector.load %arg1[%c0_14, %c0_15, %c0_16, %c1] : memref<1x1x12x512xbf16, #tpu.memory_space<vmem>>, vector<1x1x12x384xbf16>
    %13 = vector.shape_cast %12 : vector<1x1x12x384xbf16> to vector<12x384xbf16>
    %c1_17 = arith.constant 1 : index
    %c0_18 = arith.constant 0 : index
    %c0_19 = arith.constant 0 : index
    %14 = vector.load %arg2[%c1_17, %c0_18, %c0_19] : memref<3x8x12xbf16, #tpu.memory_space<vmem>>, vector<1x8x12xbf16>
    %15 = vector.shape_cast %14 : vector<1x8x12xbf16> to vector<8x12xbf16>
    %cst_20 = arith.constant dense<0.000000e+00> : vector<8x384xf32>
    %16 = tpu.matmul %15, %13, %cst_20 {dimension_numbers = #tpu.dot_dimension_numbers<[1], [0], [0], [1], [0, 0, 1, 1], [], []>} : vector<8x12xbf16>, vector<12x384xbf16>, vector<8x384xf32> -> vector<8x384xf32>
    %17 = arith.addf %11, %16 : vector<8x384xf32>
    %c0_21 = arith.constant 0 : index
    %c0_22 = arith.constant 0 : index
    %c0_23 = arith.constant 0 : index
    %c2 = arith.constant 2 : index
    %18 = vector.load %arg1[%c0_21, %c0_22, %c0_23, %c2] : memref<1x1x12x512xbf16, #tpu.memory_space<vmem>>, vector<1x1x12x384xbf16>
    %19 = vector.shape_cast %18 : vector<1x1x12x384xbf16> to vector<12x384xbf16>
    %c2_24 = arith.constant 2 : index
    %c0_25 = arith.constant 0 : index
    %c0_26 = arith.constant 0 : index
    %20 = vector.load %arg2[%c2_24, %c0_25, %c0_26] : memref<3x8x12xbf16, #tpu.memory_space<vmem>>, vector<1x8x12xbf16>
    %21 = vector.shape_cast %20 : vector<1x8x12xbf16> to vector<8x12xbf16>
    %cst_27 = arith.constant dense<0.000000e+00> : vector<8x384xf32>
    %22 = tpu.matmul %21, %19, %cst_27 {dimension_numbers = #tpu.dot_dimension_numbers<[1], [0], [0], [1], [0, 0, 1, 1], [], []>} : vector<8x12xbf16>, vector<12x384xbf16>, vector<8x384xf32> -> vector<8x384xf32>
    %23 = arith.addf %17, %22 : vector<8x384xf32>
    %c0_28 = arith.constant 0 : index
    %c0_29 = arith.constant 0 : index
    %24 = vector.load %arg3[%c0_28, %c0_29] : memref<8x1xf32, #tpu.memory_space<vmem>>, vector<8x1xf32>
    %25 = vector.broadcast %24 : vector<8x1xf32> to vector<8x384xf32>
    %26 = arith.mulf %23, %25 : vector<8x384xf32>
    %c0_30 = arith.constant 0 : index
    %c0_31 = arith.constant 0 : index
    %27 = vector.load %arg4[%c0_30, %c0_31] : memref<8x1xf32, #tpu.memory_space<vmem>>, vector<8x1xf32>
    %28 = vector.broadcast %27 : vector<8x1xf32> to vector<8x384xf32>
    %29 = arith.addf %26, %28 : vector<8x384xf32>
    %cst_32 = arith.constant 0.000000e+00 : f32
    %30 = vector.broadcast %cst_32 : f32 to vector<8x384xf32>
    %31 = arith.maximumf %29, %30 : vector<8x384xf32>
    %32 = vector.broadcast %4 : vector<1x384xf32> to vector<8x384xf32>
    %33 = arith.mulf %31, %32 : vector<8x384xf32>
    %34 = arith.truncf %33 : vector<8x384xf32> to vector<8x384xbf16>
    %c0_33 = arith.constant 0 : index
    %c128 = arith.constant 128 : index
    %35 = vector.load %arg13[%c0_33, %c128] : memref<8x640xbf16, #tpu.memory_space<vmem>>, vector<8x384xbf16>
    tpu.vector_store %arg13[%c0_33, %c128], %34 {strides = array<i32>} : memref<8x640xbf16, #tpu.memory_space<vmem>>, vector<8x384xbf16>,
    %cst_34 = arith.constant 0.000000e+00 : f32
    %36 = vector.broadcast %cst_34 : f32 to vector<8x384xf32>
    %c0_35 = arith.constant 0 : index
    %c109 = arith.constant 109 : index
    %37 = vector.load %arg13[%c0_35, %c109] : memref<8x640xbf16, #tpu.memory_space<vmem>>, vector<8x384xbf16>
    %c0_36 = arith.constant 0 : index
    %c0_37 = arith.constant 0 : index
    %c0_38 = arith.constant 0 : index
    %38 = vector.load %arg5[%c0_36, %c0_37, %c0_38] : memref<9x8x8xbf16, #tpu.memory_space<vmem>>, vector<1x8x8xbf16>
    %39 = vector.shape_cast %38 : vector<1x8x8xbf16> to vector<8x8xbf16>
    %cst_39 = arith.constant dense<0.000000e+00> : vector<8x384xf32>
    %40 = tpu.matmul %39, %37, %cst_39 {dimension_numbers = #tpu.dot_dimension_numbers<[1], [0], [0], [1], [0, 0, 1, 1], [], []>} : vector<8x8xbf16>, vector<8x384xbf16>, vector<8x384xf32> -> vector<8x384xf32>
    %41 = arith.addf %36, %40 : vector<8x384xf32>
    %c0_40 = arith.constant 0 : index
    %c110 = arith.constant 110 : index
    %42 = vector.load %arg13[%c0_40, %c110] : memref<8x640xbf16, #tpu.memory_space<vmem>>, vector<8x384xbf16>
    %c1_41 = arith.constant 1 : index
    %c0_42 = arith.constant 0 : index
    %c0_43 = arith.constant 0 : index
    %43 = vector.load %arg5[%c1_41, %c0_42, %c0_43] : memref<9x8x8xbf16, #tpu.memory_space<vmem>>, vector<1x8x8xbf16>
    %44 = vector.shape_cast %43 : vector<1x8x8xbf16> to vector<8x8xbf16>
    %cst_44 = arith.constant dense<0.000000e+00> : vector<8x384xf32>
    %45 = tpu.matmul %44, %42, %cst_44 {dimension_numbers = #tpu.dot_dimension_numbers<[1], [0], [0], [1], [0, 0, 1, 1], [], []>} : vector<8x8xbf16>, vector<8x384xbf16>, vector<8x384xf32> -> vector<8x384xf32>
    %46 = arith.addf %41, %45 : vector<8x384xf32>
    %c0_45 = arith.constant 0 : index
    %c111 = arith.constant 111 : index
    %47 = vector.load %arg13[%c0_45, %c111] : memref<8x640xbf16, #tpu.memory_space<vmem>>, vector<8x384xbf16>
    %c2_46 = arith.constant 2 : index
    %c0_47 = arith.constant 0 : index
    %c0_48 = arith.constant 0 : index
    %48 = vector.load %arg5[%c2_46, %c0_47, %c0_48] : memref<9x8x8xbf16, #tpu.memory_space<vmem>>, vector<1x8x8xbf16>
    %49 = vector.shape_cast %48 : vector<1x8x8xbf16> to vector<8x8xbf16>
    %cst_49 = arith.constant dense<0.000000e+00> : vector<8x384xf32>
    %50 = tpu.matmul %49, %47, %cst_49 {dimension_numbers = #tpu.dot_dimension_numbers<[1], [0], [0], [1], [0, 0, 1, 1], [], []>} : vector<8x8xbf16>, vector<8x384xbf16>, vector<8x384xf32> -> vector<8x384xf32>
    %51 = arith.addf %46, %50 : vector<8x384xf32>
    %c0_50 = arith.constant 0 : index
    %c127 = arith.constant 127 : index
    %52 = vector.load %arg13[%c0_50, %c127] : memref<8x640xbf16, #tpu.memory_space<vmem>>, vector<8x384xbf16>
    %c3 = arith.constant 3 : index
    %c0_51 = arith.constant 0 : index
    %c0_52 = arith.constant 0 : index
    %53 = vector.load %arg5[%c3, %c0_51, %c0_52] : memref<9x8x8xbf16, #tpu.memory_space<vmem>>, vector<1x8x8xbf16>
    %54 = vector.shape_cast %53 : vector<1x8x8xbf16> to vector<8x8xbf16>
    %cst_53 = arith.constant dense<0.000000e+00> : vector<8x384xf32>
    %55 = tpu.matmul %54, %52, %cst_53 {dimension_numbers = #tpu.dot_dimension_numbers<[1], [0], [0], [1], [0, 0, 1, 1], [], []>} : vector<8x8xbf16>, vector<8x384xbf16>, vector<8x384xf32> -> vector<8x384xf32>
    %56 = arith.addf %51, %55 : vector<8x384xf32>
    %c0_54 = arith.constant 0 : index
    %c128_55 = arith.constant 128 : index
    %57 = vector.load %arg13[%c0_54, %c128_55] : memref<8x640xbf16, #tpu.memory_space<vmem>>, vector<8x384xbf16>
    %c4 = arith.constant 4 : index
    %c0_56 = arith.constant 0 : index
    %c0_57 = arith.constant 0 : index
    %58 = vector.load %arg5[%c4, %c0_56, %c0_57] : memref<9x8x8xbf16, #tpu.memory_space<vmem>>, vector<1x8x8xbf16>
    %59 = vector.shape_cast %58 : vector<1x8x8xbf16> to vector<8x8xbf16>
    %cst_58 = arith.constant dense<0.000000e+00> : vector<8x384xf32>
    %60 = tpu.matmul %59, %57, %cst_58 {dimension_numbers = #tpu.dot_dimension_numbers<[1], [0], [0], [1], [0, 0, 1, 1], [], []>} : vector<8x8xbf16>, vector<8x384xbf16>, vector<8x384xf32> -> vector<8x384xf32>
    %61 = arith.addf %56, %60 : vector<8x384xf32>
    %c0_59 = arith.constant 0 : index
    %c129 = arith.constant 129 : index
    %62 = vector.load %arg13[%c0_59, %c129] : memref<8x640xbf16, #tpu.memory_space<vmem>>, vector<8x384xbf16>
    %c5 = arith.constant 5 : index
    %c0_60 = arith.constant 0 : index
    %c0_61 = arith.constant 0 : index
    %63 = vector.load %arg5[%c5, %c0_60, %c0_61] : memref<9x8x8xbf16, #tpu.memory_space<vmem>>, vector<1x8x8xbf16>
    %64 = vector.shape_cast %63 : vector<1x8x8xbf16> to vector<8x8xbf16>
    %cst_62 = arith.constant dense<0.000000e+00> : vector<8x384xf32>
    %65 = tpu.matmul %64, %62, %cst_62 {dimension_numbers = #tpu.dot_dimension_numbers<[1], [0], [0], [1], [0, 0, 1, 1], [], []>} : vector<8x8xbf16>, vector<8x384xbf16>, vector<8x384xf32> -> vector<8x384xf32>
    %66 = arith.addf %61, %65 : vector<8x384xf32>
    %c0_63 = arith.constant 0 : index
    %c145 = arith.constant 145 : index
    %67 = vector.load %arg13[%c0_63, %c145] : memref<8x640xbf16, #tpu.memory_space<vmem>>, vector<8x384xbf16>
    %c6 = arith.constant 6 : index
    %c0_64 = arith.constant 0 : index
    %c0_65 = arith.constant 0 : index
    %68 = vector.load %arg5[%c6, %c0_64, %c0_65] : memref<9x8x8xbf16, #tpu.memory_space<vmem>>, vector<1x8x8xbf16>
    %69 = vector.shape_cast %68 : vector<1x8x8xbf16> to vector<8x8xbf16>
    %cst_66 = arith.constant dense<0.000000e+00> : vector<8x384xf32>
    %70 = tpu.matmul %69, %67, %cst_66 {dimension_numbers = #tpu.dot_dimension_numbers<[1], [0], [0], [1], [0, 0, 1, 1], [], []>} : vector<8x8xbf16>, vector<8x384xbf16>, vector<8x384xf32> -> vector<8x384xf32>
    %71 = arith.addf %66, %70 : vector<8x384xf32>
    %c0_67 = arith.constant 0 : index
    %c146 = arith.constant 146 : index
    %72 = vector.load %arg13[%c0_67, %c146] : memref<8x640xbf16, #tpu.memory_space<vmem>>, vector<8x384xbf16>
    %c7 = arith.constant 7 : index
    %c0_68 = arith.constant 0 : index
    %c0_69 = arith.constant 0 : index
    %73 = vector.load %arg5[%c7, %c0_68, %c0_69] : memref<9x8x8xbf16, #tpu.memory_space<vmem>>, vector<1x8x8xbf16>
    %74 = vector.shape_cast %73 : vector<1x8x8xbf16> to vector<8x8xbf16>
    %cst_70 = arith.constant dense<0.000000e+00> : vector<8x384xf32>
    %75 = tpu.matmul %74, %72, %cst_70 {dimension_numbers = #tpu.dot_dimension_numbers<[1], [0], [0], [1], [0, 0, 1, 1], [], []>} : vector<8x8xbf16>, vector<8x384xbf16>, vector<8x384xf32> -> vector<8x384xf32>
    %76 = arith.addf %71, %75 : vector<8x384xf32>
    %c0_71 = arith.constant 0 : index
    %c147 = arith.constant 147 : index
    %77 = vector.load %arg13[%c0_71, %c147] : memref<8x640xbf16, #tpu.memory_space<vmem>>, vector<8x384xbf16>
    %c8 = arith.constant 8 : index
    %c0_72 = arith.constant 0 : index
    %c0_73 = arith.constant 0 : index
    %78 = vector.load %arg5[%c8, %c0_72, %c0_73] : memref<9x8x8xbf16, #tpu.memory_space<vmem>>, vector<1x8x8xbf16>
    %79 = vector.shape_cast %78 : vector<1x8x8xbf16> to vector<8x8xbf16>
    %cst_74 = arith.constant dense<0.000000e+00> : vector<8x384xf32>
    %80 = tpu.matmul %79, %77, %cst_74 {dimension_numbers = #tpu.dot_dimension_numbers<[1], [0], [0], [1], [0, 0, 1, 1], [], []>} : vector<8x8xbf16>, vector<8x384xbf16>, vector<8x384xf32> -> vector<8x384xf32>
    %81 = arith.addf %76, %80 : vector<8x384xf32>
    %c0_75 = arith.constant 0 : index
    %c0_76 = arith.constant 0 : index
    %82 = vector.load %arg6[%c0_75, %c0_76] : memref<8x1xf32, #tpu.memory_space<vmem>>, vector<8x1xf32>
    %83 = vector.broadcast %82 : vector<8x1xf32> to vector<8x384xf32>
    %84 = arith.mulf %81, %83 : vector<8x384xf32>
    %c0_77 = arith.constant 0 : index
    %c0_78 = arith.constant 0 : index
    %85 = vector.load %arg7[%c0_77, %c0_78] : memref<8x1xf32, #tpu.memory_space<vmem>>, vector<8x1xf32>
    %86 = vector.broadcast %85 : vector<8x1xf32> to vector<8x384xf32>
    %87 = arith.addf %84, %86 : vector<8x384xf32>
    %c0_79 = arith.constant 0 : index
    %c0_80 = arith.constant 0 : index
    %c0_81 = arith.constant 0 : index
    %c1_82 = arith.constant 1 : index
    %88 = vector.load %arg1[%c0_79, %c0_80, %c0_81, %c1_82] : memref<1x1x12x512xbf16, #tpu.memory_space<vmem>>, vector<1x1x4x384xbf16>
    %89 = vector.shape_cast %88 : vector<1x1x4x384xbf16> to vector<4x384xbf16>
    %c0_83 = arith.constant 0 : index
    %c0_84 = arith.constant 0 : index
    %90 = vector.load %arg8[%c0_83, %c0_84] : memref<8x4xbf16, #tpu.memory_space<vmem>>, vector<8x4xbf16>
    %cst_85 = arith.constant dense<0.000000e+00> : vector<8x384xf32>
    %91 = tpu.matmul %90, %89, %cst_85 {dimension_numbers = #tpu.dot_dimension_numbers<[1], [0], [0], [1], [0, 0, 1, 1], [], []>} : vector<8x4xbf16>, vector<4x384xbf16>, vector<8x384xf32> -> vector<8x384xf32>
    %c0_86 = arith.constant 0 : index
    %c0_87 = arith.constant 0 : index
    %92 = vector.load %arg9[%c0_86, %c0_87] : memref<8x1xf32, #tpu.memory_space<vmem>>, vector<8x1xf32>
    %93 = vector.broadcast %92 : vector<8x1xf32> to vector<8x384xf32>
    %94 = arith.mulf %91, %93 : vector<8x384xf32>
    %c0_88 = arith.constant 0 : index
    %c0_89 = arith.constant 0 : index
    %95 = vector.load %arg10[%c0_88, %c0_89] : memref<8x1xf32, #tpu.memory_space<vmem>>, vector<8x1xf32>
    %96 = vector.broadcast %95 : vector<8x1xf32> to vector<8x384xf32>
    %97 = arith.addf %94, %96 : vector<8x384xf32>
    %98 = arith.addf %87, %97 : vector<8x384xf32>
    %cst_90 = arith.constant 0.000000e+00 : f32
    %99 = vector.broadcast %cst_90 : f32 to vector<8x384xf32>
    %100 = arith.maximumf %98, %99 : vector<8x384xf32>
    %101 = arith.truncf %100 : vector<8x384xf32> to vector<8x384xbf16>
    %c0_91 = arith.constant 0 : index
    %c0_92 = arith.constant 0 : index
    %c0_93 = arith.constant 0 : index
    %102 = vector.load %arg12[%c0_91, %c0_92, %c0_93] : memref<1x8x384xbf16, #tpu.memory_space<vmem>>, vector<1x8x384xbf16>
    %103 = vector.shape_cast %102 : vector<1x8x384xbf16> to vector<8x384xbf16>
    %104 = vector.shape_cast %101 : vector<8x384xbf16> to vector<1x8x384xbf16>
    tpu.vector_store %arg12[%c0_91, %c0_92, %c0_93], %104 {strides = array<i32>} : memref<1x8x384xbf16, #tpu.memory_space<vmem>>, vector<1x8x384xbf16>,
    return
  }
  func.func @transform_0(%arg0: i32) -> (i32, i32, i32, i32) {
    %c0_i32 = arith.constant 0 : i32
    %c0_i32_0 = arith.constant 0 : i32
    %c0_i32_1 = arith.constant 0 : i32
    %c0_i32_2 = arith.constant 0 : i32
    return %arg0, %c0_i32, %c0_i32_0, %c0_i32_1 : i32, i32, i32, i32
  }
  func.func @transform_1(%arg0: i32) -> (i32, i32, i32) {
    %c0_i32 = arith.constant 0 : i32
    %c0_i32_0 = arith.constant 0 : i32
    %c0_i32_1 = arith.constant 0 : i32
    %c0_i32_2 = arith.constant 0 : i32
    return %c0_i32, %c0_i32_0, %c0_i32_1 : i32, i32, i32
  }
  func.func @transform_2(%arg0: i32) -> (i32, i32) {
    %c0_i32 = arith.constant 0 : i32
    %c0_i32_0 = arith.constant 0 : i32
    %c0_i32_1 = arith.constant 0 : i32
    return %c0_i32, %c0_i32_0 : i32, i32
  }
  func.func @transform_3(%arg0: i32) -> (i32, i32) {
    %c0_i32 = arith.constant 0 : i32
    %c0_i32_0 = arith.constant 0 : i32
    %c0_i32_1 = arith.constant 0 : i32
    return %c0_i32, %c0_i32_0 : i32, i32
  }
  func.func @transform_4(%arg0: i32) -> (i32, i32, i32) {
    %c0_i32 = arith.constant 0 : i32
    %c0_i32_0 = arith.constant 0 : i32
    %c0_i32_1 = arith.constant 0 : i32
    %c0_i32_2 = arith.constant 0 : i32
    return %c0_i32, %c0_i32_0, %c0_i32_1 : i32, i32, i32
  }
  func.func @transform_5(%arg0: i32) -> (i32, i32) {
    %c0_i32 = arith.constant 0 : i32
    %c0_i32_0 = arith.constant 0 : i32
    %c0_i32_1 = arith.constant 0 : i32
    return %c0_i32, %c0_i32_0 : i32, i32
  }
  func.func @transform_6(%arg0: i32) -> (i32, i32) {
    %c0_i32 = arith.constant 0 : i32
    %c0_i32_0 = arith.constant 0 : i32
    %c0_i32_1 = arith.constant 0 : i32
    return %c0_i32, %c0_i32_0 : i32, i32
  }
  func.func @transform_7(%arg0: i32) -> (i32, i32) {
    %c0_i32 = arith.constant 0 : i32
    %c0_i32_0 = arith.constant 0 : i32
    %c0_i32_1 = arith.constant 0 : i32
    return %c0_i32, %c0_i32_0 : i32, i32
  }
  func.func @transform_8(%arg0: i32) -> (i32, i32) {
    %c0_i32 = arith.constant 0 : i32
    %c0_i32_0 = arith.constant 0 : i32
    %c0_i32_1 = arith.constant 0 : i32
    return %c0_i32, %c0_i32_0 : i32, i32
  }
  func.func @transform_9(%arg0: i32) -> (i32, i32) {
    %c0_i32 = arith.constant 0 : i32
    %c0_i32_0 = arith.constant 0 : i32
    %c0_i32_1 = arith.constant 0 : i32
    return %c0_i32, %c0_i32_0 : i32, i32
  }
  func.func @transform_10(%arg0: i32) -> (i32, i32) {
    %c0_i32 = arith.constant 0 : i32
    %c0_i32_0 = arith.constant 0 : i32
    %c0_i32_1 = arith.constant 0 : i32
    return %c0_i32, %c0_i32_0 : i32, i32
  }
  func.func @transform_11(%arg0: i32) -> (i32, i32, i32) {
    %c0_i32 = arith.constant 0 : i32
    %c0_i32_0 = arith.constant 0 : i32
    %c0_i32_1 = arith.constant 0 : i32
    return %arg0, %c0_i32, %c0_i32_0 : i32, i32, i32
  }
}

</mosaic_0001>

<bundles_post_ra>
// kernel: tpu_custom_call.1
= control target key start
LH: loop header
LB: loop body
LE: loop exit
PB: predicated region body
PF: predicated region fallthrough
CT: control target
= control target key end

     0   :  { %s2761_s0 = inlined_call_operand.vmem [shape: bf16[2,1,12,512], index: 0, kind: input, shape index: {}]   ;;  %s2762_s1 = inlined_call_operand.vmem [shape: bf16[3,8,12], index: 1, kind: input, shape index: {}]   ;;  %s2763_s2 = inlined_call_operand.vmem [shape: f32[8,1], index: 2, kind: input, shape index: {}]   ;;  %s2764_s3 = inlined_call_operand.vmem [shape: f32[8,1], index: 3, kind: input, shape index: {}]   ;;  %s2765_s4 = inlined_call_operand.vmem [shape: bf16[9,8,8], index: 4, kind: input, shape index: {}]   ;;  %s2766_s5 = inlined_call_operand.vmem [shape: f32[8,1], index: 5, kind: input, shape index: {}]   ;;  %s2767_s6 = inlined_call_operand.vmem [shape: f32[8,1], index: 6, kind: input, shape index: {}]   ;;  %s2768_s7 = inlined_call_operand.vmem [shape: bf16[8,4], index: 7, kind: input, shape index: {}]   ;;  %s2769_s8 = inlined_call_operand.vmem [shape: f32[8,1], index: 8, kind: input, shape index: {}]   ;;  %s2770_s9 = inlined_call_operand.vmem [shape: f32[8,1], index: 9, kind: input, shape index: {}]   ;;  %s2771_s10 = inlined_call_operand.vmem [shape: f32[1,384], index: 10, kind: input, shape index: {}]   ;;  %s2772_s11 = inlined_call_operand.hbm [shape: bf16[2,8,384], index: 11, kind: output, shape index: {}]  }
   0x1   :  { %2773 = sst [smem:[#allocation6_spill]] %s2761_s0 }
   0x2   :  { %2774 = sst [smem:[#allocation7_spill]] %s2762_s1 }
   0x3   :  { %16 = vsyncpa [#allocation4], 0 }
   0x4   :  { %18 = vsyncpa [#allocation4 + $0x1], 0  ;;  %s2441_s17 = smov 0   ;;  %s2443_s18 = smov 0  }
   0x5   :  { %s2445_s19 = smov 0   ;;  %s2447_s20 = smov 0  }
   0x6 LB: > { %s2462_s21 = sadd.s32 4294967295, %s2366_s20   ;;  %s2040_s22 = sadd.s32 4294967294, %s2366_s20   ;;  %s2366_s20 = sphi %s2447_s20, %s2782_s20   ;;  %s2362_s19 = sphi %s2445_s19, %s2781_s19   ;;  %s2358_s18 = sphi %s2443_s18, %s2780_s18   ;;  %s2354_s17 = sphi %s2441_s17, %s2779_s17  }
   0x7   : > { %s2466_s23 = sadd.s32 1, %s2366_s20   ;;  %s267_s24 = sadd.s32 1, %s2362_s19 }
   0x8   : > { %s264_s25 = ssub.s32 %s2366_s20, %s2466_s23  ;;  %p277_p0 = scmp.ne.s32.totalorder %s2362_s19, %s2358_s18 }
   0x9   : > { %p265_p1 = scmp.eq.s32.totalorder %s264_s25, 0  ;;  %p278_p2 = scmp.eq.s32.totalorder %s2462_s21, 1 }
   0xa   : > { %p283_p3 = scmp.ne.s32.totalorder %s2358_s18, %s2354_s17  ;;  %p284_p4 = scmp.eq.s32.totalorder %s2040_s22, 1 }
   0xb   : > { %s2477_s26 = scalar_select %p265_p1, %s2362_s19, %s267_s24  }
   0xc   : > { %p2479_p5 = por %p278_p2, %p277_p0  ;;  %p2483_p6 = por %p284_p4, %p283_p3 }
   0xd   : > { %p2043_p7 = scmp.ge.s32.totalorder %s2366_s20, 1  ;;  %p340_p8 = scmp.lt.s32.totalorder %s2366_s20, 3 }
   0xf   : > { %p341_p9 = pnand %p2043_p7, %p340_p8 }
  0x10   : > { %p380_p10 = scmp.lt.s32.totalorder (!%p341_p9), %s2462_s21, 1  ;;  %s2777_s0 = sld [smem:[#allocation6_spill]] (!%p341_p9) }
  0x11   : > { %344 = sbr.rel (%p341_p9) target bundleno = 800 (0x320), region = 64  ;;  %s2371_s15 = smov (!%p341_p9), 127  }
  0x12   : > { %s2372_s16 = smov (!%p341_p9), 126   ;;  %s2778_s1 = sld [smem:[#allocation7_spill]] (!%p341_p9) }
  0x13   : > { %s2374_s12 = smov (!%p341_p9), 19   ;;  %s2375_s13 = smov (!%p341_p9), 17  }
  0x14   : > { %s2377_s22 = smov (!%p341_p9), 111   ;;  %s2378_s24 = smov (!%p341_p9), 110  }
  0x15   : > { %s2379_s25 = smov (!%p341_p9), 109  }
  0x16   : > { %s381_s29 = scalar_select %p380_p10, %s2462_s21, 1  ;;  %v2368_v0 = vmov 0.0   ;;  %v2369_v1 = vmov 0   ;;  %vm2370_vm0 = vmmov 0   ;;  %v738_v6 = vld [vmem:[%s2764_s3] sm:$0xff]  ;;  %vm422_vm1 = vcmask 1039360  }
  0x17   : > { %2153 = vmatprep.subr.bf16.mxu1 %v2368_v0  ;;  %472 = vmatprep.mubr.bf16.mxu0 %v2369_v1  ;;  %386 = vst [vmem:[#allocation2] sm:$0xf] %v2369_v1  ;;  %387 = vst [vmem:[#allocation2 + $0x10] sm:$0xf] %v2369_v1  ;;  %v729_v7 = vld [vmem:[%s2763_s2] sm:$0xff]  ;;  %vm430_vm2 = vcmask 1045504   ;;  %v751_v41 = vlaneseq }
  0x18   : > { %s2122_s30 = sshll.u32 %s381_s29, 5  ;;  %2155 = vmatprep.mubr.msk.bf16.mxu1 %vm2370_vm0, %v2368_v0  ;;  %2284 = vset.pattern.permute.xlu0 %v2369_v1  ;;  %v2046_v17 = vld [vmem:[%s2778_s1 + $0x4] sm:$0xf]  ;;  %vm426_vm3 = vcmask 97280   ;;  %vm629_vm4 = vcmask 1031168   ;;  %vm807_vm5 = vcmask 146432  }
  0x19   : > { %s2500_s14 = scalar_lea.vmem %s2777_s0, %s2122_s30  ;;  %2285 = vset.pattern.permute.xlu1 %v2369_v1  ;;  %v393_v27 = vld [vmem:[%s2778_s1] sm:$0xf]  ;;  %v2058_v31 = vld [vmem:[%s2778_s1 + $0x8] sm:$0xf]  ;;  %v752_v46 = vshrl.u32 %v751_v41, 7  ;;  %s2373_s30 = smov 18  }
  0x1a   : > { %v2286_v2 = vld [vmem:[%s2500_s14 + $0x8] ss:$16 sps:$4 sm:$0x3f]   ;;  %v2288_v3 = vld [vmem:[%s2500_s14 + $0xc] ss:$16 sps:$4 sm:$0x3f]  }
  0x1b   : > { %418 = vrot.lane.b32.xlu1 %v2286_v2, %s2371_s15  ;;  %v2289_v4 = vld [vmem:[%s2500_s14] ss:$16 sps:$4 sm:$0x3f]   ;;  %v2291_v5 = vld [vmem:[%s2500_s14 + $0x4] ss:$16 sps:$4 sm:$0x3f]  }
  0x1c   : > { %414 = vrot.lane.b32.xlu0 %v2289_v4, %s2371_s15  ;;  %v2292_v11 = vld [vmem:[%s2500_s14 + $0x8] ss:$16 sps:$4 sm:$0x3f]   ;;  %v530_v22 = vsel %vm430_vm2, %v2289_v4, 0  ;;  %v761_v55 = vsub.s32 2, %v752_v46  ;;  %vm815_vm6 = vcmask 1043456  }
  0x1d   : > { %v536_v19 = vsel %vm430_vm2, %v2292_v11, 0  ;;  %v388_v59 = vld [vmem:[%s2771_s10] sm:$0x7]  ;;  %vm811_vm7 = vcmask 64512   ;;  %vm914_vm8 = vcmask 154624   ;;  %vm1021_vm9 = vcmask 138240  }
  0x1e   : > { %vm1131_vm10 = vcmask 7168   ;;  %vm1470_vm11 = vcmask 908288   ;;  %vm1580_vm12 = vcmask 900096   ;;  %vm1690_vm13 = vcmask 891904   ;;  %s2232_s29 = smul.u32 192, %s2462_s21  ;;  %s2380_s21 = smov [#allocation3]  }
  0x1f   : > { %420 = vrot.lane.b32.xlu1 %v2288_v3, %s2371_s15  ;;  %vm1836_vm14 = vcmask 1041408   ;;  %vm1832_vm15 = vcmask 31744  }
  0x20   : > { %416 = vrot.lane.b32.xlu0 %v2291_v5, %s2371_s15 }
  0x23   : > { %623 = vrot.lane.b32.xlu1 %v2291_v5, %s2372_s16 }
  0x24   : > { %621 = vrot.lane.b32.xlu0 %v2289_v4, %s2372_s16 }
  0x27   : > { %627 = vrot.lane.b32.xlu1 %v2288_v3, %s2372_s16  ;;  %v757_v3 = vsub.s32 1, %v752_v46 }
  0x28   : > { %625 = vrot.lane.b32.xlu0 %v2286_v2, %s2372_s16  ;;  %v753_v2 = vsub.s32 0, %v752_v46  ;;  %s2376_s16 = smov 1  }
  0x2b   : > { %741 = vperm.xlu1 %2285, %v738_v6  }
  0x2c   : > { %732 = vperm.xlu0 %2284, %v729_v7   ;;  %v762_v7 = vrot.slane %v388_v59, %v761_v55  ;;  %v2064_v55 = vld [vmem:[%s2765_s4 + $0x4] sm:$0xf] }
  0x8d   : > { %v419_v8 = vpop.permute.xlu1 %418 }
  0x8e   : > { %v415_v9 = vpop.permute.xlu0 %414 }
  0x91   : > { %v421_v10 = vpop.permute.xlu1 %420 }
  0x92   : > { %v425_v12 = vsel %vm422_vm1, %v419_v8, %v421_v10  ;;  %v417_v13 = vpop.permute.xlu0 %416 }
  0x93   : > { %v438_v14 = vsel %vm430_vm2, %v425_v12, 0  ;;  %v424_v15 = vsel %vm422_vm1, %v417_v13, %v419_v8  ;;  %v423_v16 = vsel %vm422_vm1, %v415_v9, %v417_v13 }
  0x94   : > { %2154 = vmatpush3.bf16.msra.mxu1 %v438_v14  ;;  %2051 = vmatprep.subr.msk.bf16.mxu0 %vm430_vm2, %v424_v15  ;;  %v432_v18 = vsel %vm430_vm2, %v423_v16, 0  ;;  %v754_v14 = vrot.slane %v388_v59, %v753_v2  ;;  %v758_v16 = vrot.slane %v388_v59, %v757_v3  ;;  %v786_v3 = vld [vmem:[%s2765_s4] sm:$0xf] }
  0x95   : > { %2159 = vmatprep.subr.bf16.mxu1 %v2368_v0  ;;  %v624_v20 = vpop.permute.xlu1 %623  ;;  %455 = vmatpush1.bf16.msra.mxu0 %v432_v18 }
  0x96   : > { %v622_v21 = vpop.permute.xlu0 %621  ;;  %2055 = vmatprep.subr.msk.bf16.mxu0 %vm430_vm2, %v2291_v5 }
  0x97   : > { %2156 = vmatmul.mubr.msk.bf16.vlgmr.msra.gmra.mxu1 %vm426_vm3, %v2046_v17  ;;  %v630_v25 = vsel %vm629_vm4, %v622_v21, %v624_v20 }
  0x98   : > { %2160 = vmatpush3.bf16.msra.mxu1 %v536_v19  ;;  %2161 = vmatprep.mubr.msk.bf16.mxu1 %vm2370_vm0, %v2368_v0  ;;  %v637_v30 = vsel %vm430_vm2, %v630_v25, 0 }
  0x99   : > { %2052 = vmatmul.mubr.msk.bf16.vlgmr.msra.gmra.mxu0 %vm426_vm3, %v2046_v17  ;;  %v628_v23 = vpop.permute.xlu1 %627  ;;  %2165 = vmatprep.subr.bf16.mxu1 %v2368_v0 }
  0x9a   : > { %553 = vmatpush1.bf16.msra.mxu0 %v530_v22  ;;  %570 = vmatprep.mubr.bf16.mxu0 %v2369_v1  ;;  %v626_v24 = vpop.permute.xlu0 %625 }
  0x9b   : > { %v631_v26 = vsel %vm629_vm4, %v624_v20, %v626_v24  ;;  %v632_v28 = vsel %vm629_vm4, %v626_v24, %v628_v23 }
  0x9c   : > { %2059 = vmatprep.subr.msk.bf16.mxu0 %vm430_vm2, %v631_v26  ;;  %v643_v29 = vsel %vm430_vm2, %v632_v28, 0 }
  0x9f   : > { %2162 = vmatmul.mubr.msk.bf16.vlgmr.msra.gmra.mxu1 %vm426_vm3, %v393_v27 }
  0xa0   : > { %2166 = vmatpush3.bf16.msra.mxu1 %v643_v29  ;;  %2167 = vmatprep.mubr.msk.bf16.mxu1 %vm2370_vm0, %v2368_v0 }
  0xa1   : > { %2056 = vmatmul.mubr.msk.bf16.vlgmr.msra.gmra.mxu0 %vm426_vm3, %v393_v27  ;;  %2171 = vmatprep.subr.bf16.mxu1 %v2368_v0 }
  0xa2   : > { %660 = vmatpush1.bf16.msra.mxu0 %v637_v30  ;;  %677 = vmatprep.mubr.bf16.mxu0 %v2369_v1 }
  0xa6   : > { %v742_v56 = vpop.permute.xlu1 %741 }
  0xa7   : > { %2168 = vmatmul.mubr.msk.bf16.vlgmr.msra.gmra.mxu1 %vm426_vm3, %v2058_v31  ;;  %v733_v50 = vpop.permute.xlu0 %732 }
  0xa8   : > { %2173 = vmatprep.mubr.msk.bf16.mxu1 %vm2370_vm0, %v2368_v0 }
  0xa9   : > { %2060 = vmatmul.mubr.msk.bf16.vlgmr.msra.gmra.mxu0 %vm426_vm3, %v2058_v31 }
  0xaa   : > { %857 = vmatprep.mubr.bf16.mxu0 %v2369_v1 }
 0x157   : > { %v515_v32 = vpop.f32.mrf.mxu1 }
 0x159   : > { %v474_v33 = vpop.f32.mrf.mxu0  ;;  %v2157_v34 = vpop.f32.mrf.mxu1 }
 0x15b   : > { %v476_v35 = vpop.f32.mrf.mxu0  ;;  %v518_v36 = vpop.f32.mrf.mxu1 }
 0x15c   : > { %v1808_v36 = vld [vmem:[%s2500_s14] sm:$0x33] }
 0x15d   : > { %v478_v37 = vpop.f32.mrf.mxu0  ;;  %v2158_v38 = vpop.f32.mrf.mxu1 }
 0x15e   : > { %v2111_v37 = vcombine.high %v1808_v36, %v1808_v36  ;;  %v2110_v38 = vcombine.low %v1808_v36, %v1808_v36 }
 0x15f   : > { %v479_v39 = vpop.f32.mrf.mxu0  ;;  %v613_v40 = vpop.f32.mrf.mxu1 }
 0x160   : > { %v614_v49 = vadd.f32 %v613_v40, %v515_v32  ;;  %v1809_v39 = vld [vmem:[%s2500_s14 + $0x8] sm:$0x33] }
 0x161   : > { %v572_v42 = vpop.f32.mrf.mxu0  ;;  %v2163_v43 = vpop.f32.mrf.mxu1  ;;  %v2113_v40 = vcombine.high %v1809_v39, %v1809_v39  ;;  %v2112_v41 = vcombine.low %v1809_v39, %v1809_v39 }
 0x162   : > { %v573_v53 = vadd.f32 %v572_v42, %v474_v33  ;;  %v1927_v42 = vld [vmem:[%s2769_s8] sm:$0xff] }
 0x163   : > { %v574_v44 = vpop.f32.mrf.mxu0  ;;  %v616_v45 = vpop.f32.mrf.mxu1  ;;  %v1790_v43 = vld [vmem:[%s2766_s5] sm:$0xff] }
 0x164   : > { %v575_v60 = vadd.f32 %v574_v44, %v476_v35  ;;  %v1936_v44 = vld [vmem:[%s2770_s9] sm:$0xff] }
 0x165   : > { %v576_v47 = vpop.f32.mrf.mxu0  ;;  %v2164_v48 = vpop.f32.mrf.mxu1  ;;  %v1799_v45 = vld [vmem:[%s2767_s6] sm:$0xff] }
 0x167   : > { %v577_v51 = vpop.f32.mrf.mxu0  ;;  %v720_v52 = vpop.f32.mrf.mxu1 }
 0x168   : > { %v728_v54 = vadd.f32 %v720_v52, %v614_v49 }
 0x169   : > { %v679_v57 = vpop.f32.mrf.mxu0  ;;  %v2169_v58 = vpop.f32.mrf.mxu1 }
 0x16a   : > { %v726_v61 = vadd.f32 %v679_v57, %v573_v53  ;;  %v737_v62 = vmul.f32 %v733_v50, %v728_v54 }
 0x16b   : > { %v681_v63 = vpop.f32.mrf.mxu0  ;;  %v723_v4 = vpop.f32.mrf.mxu1 }
 0x16c   : > { %v735_v5 = vmul.f32 %v733_v50, %v726_v61  ;;  %v727_v6 = vadd.f32 %v681_v63, %v575_v60  ;;  %v746_v8 = vadd.f32 %v742_v56, %v737_v62 }
 0x16d   : > { %v683_v9 = vpop.f32.mrf.mxu0  ;;  %v2170_v10 = vpop.f32.mrf.mxu1 }
 0x16e   : > { %v736_v11 = vmul.f32 %v733_v50, %v727_v6  ;;  %v744_v12 = vadd.f32 %v742_v56, %v735_v5  ;;  %v749_v13 = vmax.f32 %v746_v8, 0.0 }
 0x16f   : > { %v684_v15 = vpop.f32.mrf.mxu0 }
 0x170   : > { %v745_v17 = vadd.f32 %v742_v56, %v736_v11  ;;  %v747_v18 = vmax.f32 %v744_v12, 0.0  ;;  %v768_v19 = vmul.f32 %v762_v7, %v749_v13  ;;  %v2075_v13 = vld [vmem:[%s2765_s4 + $0x8] sm:$0xf] }
 0x172   : > { %v748_v20 = vmax.f32 %v745_v17, 0.0  ;;  %v2124_v21 = vpack.c.bf16 %v768_v19, %v768_v19  ;;  %v766_v22 = vmul.f32 %v754_v14, %v747_v18 }
 0x174   : > { %v767_v23 = vmul.f32 %v758_v16, %v748_v20  ;;  %783 = vst [vmem:[#allocation2 + $0xc] sm:$0xf] %v2124_v21  ;;  %v2566_v35 = vpack.c.bf16 %v766_v22, %v766_v22 }
 0x176   : > { %v2123_v24 = vpack.c.bf16 %v767_v23, %v766_v22  ;;  %v2561_v32 = vpack.c.bf16 %v767_v23, %v767_v23 }
 0x178   : > { %782 = vst [vmem:[#allocation2 + $0x4] sm:$0xff] %v2123_v24  ;;  %v2079_v24 = vld [vmem:[%s2765_s4 + $0xc] sm:$0xf] }
 0x17b   : > { %v1340_v31 = vld [vmem:[#allocation2 + $0xc] sm:$0xff] }
 0x17c   : > { %v2093_v33 = vcombine.low %v1340_v31, %v1340_v31  ;;  %v2094_v34 = vcombine.high %v1340_v31, %v1340_v31  ;;  %v2303_v23 = vld [vmem:[#allocation2 + $0xc] ss:$0 sps:$4 sm:$0xff]  }
 0x17f   : > { %v784_v25 = vld [vmem:[#allocation2] sm:$0xff]  ;;  %v785_v28 = vld [vmem:[#allocation2 + $0x8] sm:$0xff] }
 0x180   : > { %v2066_v26 = vcombine.high %v784_v25, %v784_v25  ;;  %v2065_v27 = vcombine.low %v784_v25, %v784_v25  ;;  %v2068_v29 = vcombine.high %v785_v28, %v785_v28  ;;  %v2067_v30 = vcombine.low %v785_v28, %v785_v28 }
 0x181   : > { %v1253_v28 = vsel %vm815_vm6, %v2303_v23, 0 }
 0x182   : > { %801 = vrot.lane.b32.xlu0 %v2066_v26, %s2373_s30  ;;  %799 = vrot.lane.b32.xlu1 %v2065_v27, %s2373_s30 }
 0x186   : > { %805 = vrot.lane.b32.xlu0 %v2068_v29, %s2373_s30  ;;  %803 = vrot.lane.b32.xlu1 %v2067_v30, %s2373_s30 }
 0x18a   : > { %908 = vrot.lane.b32.xlu0 %v2066_v26, %s2374_s12  ;;  %906 = vrot.lane.b32.xlu1 %v2065_v27, %s2374_s12 }
 0x18e   : > { %912 = vrot.lane.b32.xlu0 %v2068_v29, %s2374_s12  ;;  %910 = vrot.lane.b32.xlu1 %v2067_v30, %s2374_s12 }
 0x192   : > { %1015 = vrot.lane.b32.xlu0 %v2066_v26, %s2375_s13  ;;  %1013 = vrot.lane.b32.xlu1 %v2065_v27, %s2375_s13 }
 0x196   : > { %1019 = vrot.lane.b32.xlu0 %v2068_v29, %s2375_s13  ;;  %1017 = vrot.lane.b32.xlu1 %v2067_v30, %s2375_s13 }
 0x19a   : > { %1125 = vrot.lane.b32.xlu0 %v2066_v26, %s2376_s16  ;;  %1123 = vrot.lane.b32.xlu1 %v2065_v27, %s2376_s16  ;;  %v1247_v27 = vsel %vm815_vm6, %v2566_v35, 0 }
 0x19e   : > { %1129 = vrot.lane.b32.xlu0 %v2068_v29, %s2376_s16  ;;  %1127 = vrot.lane.b32.xlu1 %v2067_v30, %s2376_s16  ;;  %s1979_s16 = scalar_lea.hbm %s2772_s11, %s2232_s29 }
 0x1a2   : > { %1355 = vrot.lane.b32.xlu0 %v2561_v32, %s2371_s15  ;;  %1357 = vrot.lane.b32.xlu1 %v2093_v33, %s2371_s15 }
 0x1a6   : > { %1359 = vrot.lane.b32.xlu0 %v2094_v34, %s2371_s15  ;;  %1353 = vrot.lane.b32.xlu1 %v2566_v35, %s2371_s15 }
 0x1aa   : > { %1464 = vrot.lane.b32.xlu0 %v2561_v32, %s2377_s22  ;;  %1466 = vrot.lane.b32.xlu1 %v2093_v33, %s2377_s22 }
 0x1ae   : > { %1468 = vrot.lane.b32.xlu0 %v2094_v34, %s2377_s22  ;;  %1462 = vrot.lane.b32.xlu1 %v2566_v35, %s2377_s22 }
 0x1b2   : > { %1574 = vrot.lane.b32.xlu0 %v2561_v32, %s2378_s24  ;;  %1576 = vrot.lane.b32.xlu1 %v2093_v33, %s2378_s24 }
 0x1b6   : > { %1578 = vrot.lane.b32.xlu0 %v2094_v34, %s2378_s24  ;;  %1572 = vrot.lane.b32.xlu1 %v2566_v35, %s2378_s24 }
 0x1ba   : > { %1684 = vrot.lane.b32.xlu0 %v2561_v32, %s2379_s25  ;;  %1686 = vrot.lane.b32.xlu1 %v2093_v33, %s2379_s25 }
 0x1be   : > { %1688 = vrot.lane.b32.xlu0 %v2094_v34, %s2379_s25  ;;  %1682 = vrot.lane.b32.xlu1 %v2566_v35, %s2379_s25  ;;  %v2083_v34 = vld [vmem:[%s2765_s4 + $0x10] sm:$0xf] }
 0x1c2   : > { %1823 = vrot.lane.b32.xlu0 %v2111_v37, %s2371_s15  ;;  %1821 = vrot.lane.b32.xlu1 %v2110_v38, %s2371_s15 }
 0x1c6   : > { %1827 = vrot.lane.b32.xlu0 %v2113_v40, %s2371_s15  ;;  %1825 = vrot.lane.b32.xlu1 %v2112_v41, %s2371_s15  ;;  %s377_s15 = sand.u32 1, %s2358_s18  }
 0x1c7   : > { %s2231_s25 = smul.u32 12, %s377_s15  ;;  %s1967_s22 = scalar_lea.sflag [#allocation4], %s377_s15 }
 0x1c9   : > { %s379_s30 = scalar_lea.vmem [#allocation3], %s2231_s25  ;;  %s2310_s25 = sshll.u32 %s2380_s21, 4  ;;  %s2311_s25 = int_to_ptr.vmem [resolvable:$false] %s2310_s25 }
 0x1ca   : > { %1930 = vperm.xlu0 %2284, %v1927_v42   ;;  %1793 = vperm.xlu1 %2285, %v1790_v43   ;;  %s1981_s12 = sshll.u32 %s379_s30, 4  ;;  %s2312_s0 = scalar_lea.vmem %s2311_s25, 384  ;;  %s1982_s12 = int_to_ptr.vmem [resolvable:$true] %s1981_s12 }
 0x1cb   : > { %s2306_s24 = scalar_lea.vmem %s1982_s12, 192  ;;  %p2313_p0 = scmp.lt.s32.totalorder %s1982_s12, %s2311_s25 }
 0x1cc   : > { %p2307_p11 = scmp.ne.s32.totalorder %s1982_s12, %s2306_s24  ;;  %p2314_p1 = scmp.lt.s32.totalorder %s2312_s0, %s2306_s24 }
 0x1ce   : > { %1939 = vperm.xlu0 %2284, %v1936_v44   ;;  %1802 = vperm.xlu1 %2285, %v1799_v45   ;;  %v2090_v44 = vld [vmem:[%s2765_s4 + $0x14] sm:$0xf]  ;;  %p2308_p12 = pnand %p2307_p11, %p2479_p5  ;;  %p2315_p2 = por %p2314_p1, %p2313_p0 }
 0x1d0   : > { %p2309_p13 = pneg %p2308_p12 }
 0x1d2   : > { %p2316_p3 = pnand %p2315_p2, %p2309_p13 }
 0x1f4   : > { %v802_v46 = vpop.permute.xlu0 %801  ;;  %v800_v47 = vpop.permute.xlu1 %799 }
 0x1f5   : > { %v808_v48 = vsel %vm807_vm5, %v800_v47, %v802_v46 }
 0x1f6   : > { %v817_v53 = vsel %vm815_vm6, %v808_v48, 0 }
 0x1f8   : > { %v806_v49 = vpop.permute.xlu0 %805  ;;  %v804_v50 = vpop.permute.xlu1 %803 }
 0x1f9   : > { %v809_v51 = vsel %vm807_vm5, %v802_v46, %v804_v50  ;;  %v810_v52 = vsel %vm807_vm5, %v804_v50, %v806_v49 }
 0x1fa   : > { %v823_v54 = vsel %vm815_vm6, %v810_v52, 0  ;;  %2069 = vmatprep.subr.msk.bf16.mxu0 %vm815_vm6, %v809_v51 }
 0x1fb   : > { %840 = vmatpush1.bf16.msra.mxu0 %v817_v53  ;;  %2172 = vmatpush3.bf16.msra.mxu1 %v823_v54  ;;  %v2098_v54 = vld [vmem:[%s2765_s4 + $0x18] sm:$0xf] }
 0x1fc   : > { %v909_v56 = vpop.permute.xlu0 %908  ;;  %v907_v57 = vpop.permute.xlu1 %906  ;;  %2177 = vmatprep.subr.bf16.mxu1 %v2368_v0 }
 0x1fd   : > { %v915_v58 = vsel %vm914_vm8, %v907_v57, %v909_v56 }
 0x1fe   : > { %2070 = vmatmul.mubr.msk.bf16.vlgmr.msra.gmra.mxu0 %vm811_vm7, %v2064_v55  ;;  %2174 = vmatmul.mubr.msk.bf16.vlgmr.msra.gmra.mxu1 %vm811_vm7, %v2064_v55  ;;  %v922_v63 = vsel %vm815_vm6, %v915_v58, 0 }
 0x1ff   : > { %962 = vmatprep.mubr.bf16.mxu0 %v2369_v1  ;;  %2179 = vmatprep.mubr.msk.bf16.mxu1 %vm2370_vm0, %v2368_v0 }
 0x200   : > { %v913_v59 = vpop.permute.xlu0 %912  ;;  %v911_v60 = vpop.permute.xlu1 %910 }
 0x201   : > { %v916_v61 = vsel %vm914_vm8, %v909_v56, %v911_v60  ;;  %v917_v62 = vsel %vm914_vm8, %v911_v60, %v913_v59 }
 0x202   : > { %v928_v2 = vsel %vm815_vm6, %v917_v62, 0  ;;  %2072 = vmatprep.subr.msk.bf16.mxu0 %vm815_vm6, %v916_v61 }
 0x203   : > { %945 = vmatpush1.bf16.msra.mxu0 %v922_v63  ;;  %2178 = vmatpush3.bf16.msra.mxu1 %v928_v2  ;;  %v2102_v2 = vld [vmem:[%s2765_s4 + $0x1c] sm:$0xf] }
 0x204   : > { %v1016_v4 = vpop.permute.xlu0 %1015  ;;  %v1014_v5 = vpop.permute.xlu1 %1013  ;;  %2183 = vmatprep.subr.bf16.mxu1 %v2368_v0 }
 0x205   : > { %v1022_v6 = vsel %vm1021_vm9, %v1014_v5, %v1016_v4 }
 0x206   : > { %2073 = vmatmul.mubr.msk.bf16.vlgmr.msra.gmra.mxu0 %vm811_vm7, %v786_v3  ;;  %2180 = vmatmul.mubr.msk.bf16.vlgmr.msra.gmra.mxu1 %vm811_vm7, %v786_v3  ;;  %v1029_v11 = vsel %vm815_vm6, %v1022_v6, 0 }
 0x207   : > { %1069 = vmatprep.mubr.bf16.mxu0 %v2369_v1  ;;  %2185 = vmatprep.mubr.msk.bf16.mxu1 %vm2370_vm0, %v2368_v0 }
 0x208   : > { %v1020_v7 = vpop.permute.xlu0 %1019  ;;  %v1018_v8 = vpop.permute.xlu1 %1017 }
 0x209   : > { %v1023_v9 = vsel %vm1021_vm9, %v1016_v4, %v1018_v8  ;;  %v1024_v10 = vsel %vm1021_vm9, %v1018_v8, %v1020_v7 }
 0x20a   : > { %v1035_v12 = vsel %vm815_vm6, %v1024_v10, 0  ;;  %2076 = vmatprep.subr.msk.bf16.mxu0 %vm815_vm6, %v1023_v9 }
 0x20b   : > { %1052 = vmatpush1.bf16.msra.mxu0 %v1029_v11  ;;  %2184 = vmatpush3.bf16.msra.mxu1 %v1035_v12  ;;  %v2106_v12 = vld [vmem:[%s2765_s4 + $0x20] sm:$0xf] }
 0x20c   : > { %v1126_v14 = vpop.permute.xlu0 %1125  ;;  %v1124_v15 = vpop.permute.xlu1 %1123  ;;  %2189 = vmatprep.subr.bf16.mxu1 %v2368_v0 }
 0x20d   : > { %v1132_v16 = vsel %vm1131_vm10, %v1124_v15, %v1126_v14  ;;  %v1810_v15 = vld [vmem:[%s2768_s7] sm:$0xf] }
 0x20e   : > { %2077 = vmatmul.mubr.msk.bf16.vlgmr.msra.gmra.mxu0 %vm811_vm7, %v2075_v13  ;;  %2186 = vmatmul.mubr.msk.bf16.vlgmr.msra.gmra.mxu1 %vm811_vm7, %v2075_v13  ;;  %v1139_v21 = vsel %vm815_vm6, %v1132_v16, 0 }
 0x20f   : > { %1179 = vmatprep.mubr.bf16.mxu0 %v2369_v1  ;;  %2191 = vmatprep.mubr.msk.bf16.mxu1 %vm2370_vm0, %v2368_v0 }
 0x210   : > { %v1130_v17 = vpop.permute.xlu0 %1129  ;;  %v1128_v18 = vpop.permute.xlu1 %1127 }
 0x211   : > { %v1133_v19 = vsel %vm1131_vm10, %v1126_v14, %v1128_v18  ;;  %v1134_v20 = vsel %vm1131_vm10, %v1128_v18, %v1130_v17 }
 0x212   : > { %v1145_v22 = vsel %vm815_vm6, %v1134_v20, 0  ;;  %2080 = vmatprep.subr.msk.bf16.mxu0 %vm815_vm6, %v1133_v19 }
 0x213   : > { %1162 = vmatpush1.bf16.msra.mxu0 %v1139_v21  ;;  %2190 = vmatpush3.bf16.msra.mxu1 %v1145_v22 }
 0x214   : > { %v1356_v25 = vpop.permute.xlu0 %1355  ;;  %2087 = vmatprep.subr.msk.bf16.mxu0 %vm815_vm6, %v2561_v32  ;;  %v1358_v26 = vpop.permute.xlu1 %1357  ;;  %2195 = vmatprep.subr.bf16.mxu1 %v2368_v0 }
 0x215   : > { %v1362_v29 = vsel %vm422_vm1, %v1356_v25, %v1358_v26 }
 0x216   : > { %2081 = vmatmul.mubr.msk.bf16.vlgmr.msra.gmra.mxu0 %vm811_vm7, %v2079_v24  ;;  %2192 = vmatmul.mubr.msk.bf16.vlgmr.msra.gmra.mxu1 %vm811_vm7, %v2079_v24 }
 0x217   : > { %1270 = vmatpush1.bf16.msra.mxu0 %v1247_v27  ;;  %2196 = vmatpush3.bf16.msra.mxu1 %v1253_v28 }
 0x218   : > { %v1360_v30 = vpop.permute.xlu0 %1359  ;;  %2095 = vmatprep.subr.msk.bf16.mxu0 %vm815_vm6, %v1362_v29  ;;  %v1354_v31 = vpop.permute.xlu1 %1353  ;;  %1287 = vmatprep.mubr.bf16.mxu0 %v2369_v1 }
 0x219   : > { %2197 = vmatprep.mubr.msk.bf16.mxu1 %vm2370_vm0, %v2368_v0  ;;  %2201 = vmatprep.subr.bf16.mxu1 %v2368_v0  ;;  %v1363_v32 = vsel %vm422_vm1, %v1358_v26, %v1360_v30  ;;  %v1361_v33 = vsel %vm422_vm1, %v1354_v31, %v1356_v25 }
 0x21a   : > { %v1374_v38 = vsel %vm815_vm6, %v1363_v32, 0  ;;  %v1368_v39 = vsel %vm815_vm6, %v1361_v33, 0 }
 0x21c   : > { %v1465_v35 = vpop.permute.xlu0 %1464  ;;  %v1467_v36 = vpop.permute.xlu1 %1466 }
 0x21d   : > { %v1472_v37 = vsel %vm1470_vm11, %v1465_v35, %v1467_v36 }
 0x21e   : > { %2088 = vmatmul.mubr.msk.bf16.vlgmr.msra.gmra.mxu0 %vm811_vm7, %v2083_v34  ;;  %2198 = vmatmul.mubr.msk.bf16.vlgmr.msra.gmra.mxu1 %vm811_vm7, %v2083_v34 }
 0x21f   : > { %1391 = vmatpush1.bf16.msra.mxu0 %v1368_v39  ;;  %2202 = vmatpush3.bf16.msra.mxu1 %v1374_v38 }
 0x220   : > { %2099 = vmatprep.subr.msk.bf16.mxu0 %vm815_vm6, %v1472_v37  ;;  %v1469_v40 = vpop.permute.xlu0 %1468  ;;  %v1463_v41 = vpop.permute.xlu1 %1462  ;;  %1408 = vmatprep.mubr.bf16.mxu0 %v2369_v1 }
 0x221   : > { %2203 = vmatprep.mubr.msk.bf16.mxu1 %vm2370_vm0, %v2368_v0  ;;  %2207 = vmatprep.subr.bf16.mxu1 %v2368_v0  ;;  %v1473_v42 = vsel %vm1470_vm11, %v1467_v36, %v1469_v40  ;;  %v1471_v43 = vsel %vm1470_vm11, %v1463_v41, %v1465_v35 }
 0x222   : > { %v1484_v48 = vsel %vm815_vm6, %v1473_v42, 0  ;;  %v1478_v49 = vsel %vm815_vm6, %v1471_v43, 0 }
 0x224   : > { %v1575_v45 = vpop.permute.xlu0 %1574  ;;  %v1577_v46 = vpop.permute.xlu1 %1576 }
 0x225   : > { %v1582_v47 = vsel %vm1580_vm12, %v1575_v45, %v1577_v46 }
 0x226   : > { %2096 = vmatmul.mubr.msk.bf16.vlgmr.msra.gmra.mxu0 %vm811_vm7, %v2090_v44  ;;  %2204 = vmatmul.mubr.msk.bf16.vlgmr.msra.gmra.mxu1 %vm811_vm7, %v2090_v44 }
 0x227   : > { %1501 = vmatpush1.bf16.msra.mxu0 %v1478_v49  ;;  %2208 = vmatpush3.bf16.msra.mxu1 %v1484_v48 }
 0x228   : > { %2103 = vmatprep.subr.msk.bf16.mxu0 %vm815_vm6, %v1582_v47  ;;  %v1579_v50 = vpop.permute.xlu0 %1578  ;;  %v1573_v51 = vpop.permute.xlu1 %1572  ;;  %1518 = vmatprep.mubr.bf16.mxu0 %v2369_v1 }
 0x229   : > { %2209 = vmatprep.mubr.msk.bf16.mxu1 %vm2370_vm0, %v2368_v0  ;;  %2213 = vmatprep.subr.bf16.mxu1 %v2368_v0  ;;  %v1583_v52 = vsel %vm1580_vm12, %v1577_v46, %v1579_v50  ;;  %v1581_v53 = vsel %vm1580_vm12, %v1573_v51, %v1575_v45 }
 0x22a   : > { %v1594_v58 = vsel %vm815_vm6, %v1583_v52, 0  ;;  %v1588_v59 = vsel %vm815_vm6, %v1581_v53, 0 }
 0x22c   : > { %v1685_v55 = vpop.permute.xlu0 %1684  ;;  %v1687_v56 = vpop.permute.xlu1 %1686 }
 0x22d   : > { %v1692_v57 = vsel %vm1690_vm13, %v1685_v55, %v1687_v56 }
 0x22e   : > { %2100 = vmatmul.mubr.msk.bf16.vlgmr.msra.gmra.mxu0 %vm811_vm7, %v2098_v54  ;;  %2210 = vmatmul.mubr.msk.bf16.vlgmr.msra.gmra.mxu1 %vm811_vm7, %v2098_v54 }
 0x22f   : > { %1611 = vmatpush1.bf16.msra.mxu0 %v1588_v59  ;;  %2214 = vmatpush3.bf16.msra.mxu1 %v1594_v58 }
 0x230   : > { %2107 = vmatprep.subr.msk.bf16.mxu0 %vm815_vm6, %v1692_v57  ;;  %v1689_v60 = vpop.permute.xlu0 %1688  ;;  %v1683_v61 = vpop.permute.xlu1 %1682  ;;  %1628 = vmatprep.mubr.bf16.mxu0 %v2369_v1 }
 0x231   : > { %2215 = vmatprep.mubr.msk.bf16.mxu1 %vm2370_vm0, %v2368_v0  ;;  %2219 = vmatprep.subr.bf16.mxu1 %v2368_v0  ;;  %v1693_v62 = vsel %vm1690_vm13, %v1687_v56, %v1689_v60  ;;  %v1691_v63 = vsel %vm1690_vm13, %v1683_v61, %v1685_v55 }
 0x232   : > { %v1704_v5 = vsel %vm815_vm6, %v1693_v62, 0  ;;  %v1698_v6 = vsel %vm815_vm6, %v1691_v63, 0 }
 0x234   : > { %v1822_v3 = vpop.permute.xlu1 %1821  ;;  %v1824_v4 = vpop.permute.xlu0 %1823 }
 0x235   : > { %v1829_v9 = vsel %vm422_vm1, %v1822_v3, %v1824_v4 }
 0x236   : > { %2104 = vmatmul.mubr.msk.bf16.vlgmr.msra.gmra.mxu0 %vm811_vm7, %v2102_v2  ;;  %2216 = vmatmul.mubr.msk.bf16.vlgmr.msra.gmra.mxu1 %vm811_vm7, %v2102_v2  ;;  %v1838_v13 = vsel %vm1836_vm14, %v1829_v9, 0 }
 0x237   : > { %1721 = vmatpush1.bf16.msra.mxu0 %v1698_v6  ;;  %2220 = vmatpush3.bf16.msra.mxu1 %v1704_v5 }
 0x238   : > { %v1826_v7 = vpop.permute.xlu1 %1825  ;;  %1738 = vmatprep.mubr.bf16.mxu0 %v2369_v1  ;;  %2221 = vmatprep.mubr.msk.bf16.mxu1 %vm2370_vm0, %v2368_v0  ;;  %v1828_v8 = vpop.permute.xlu0 %1827 }
 0x239   : > { %v1830_v10 = vsel %vm422_vm1, %v1824_v4, %v1826_v7  ;;  %v1831_v11 = vsel %vm422_vm1, %v1826_v7, %v1828_v8  ;;  %2225 = vmatprep.subr.bf16.mxu1 %v2368_v0 }
 0x23a   : > { %2114 = vmatprep.subr.msk.bf16.mxu0 %vm1836_vm14, %v1830_v10  ;;  %v1844_v14 = vsel %vm1836_vm14, %v1831_v11, 0 }
 0x23e   : > { %2108 = vmatmul.mubr.msk.bf16.vlgmr.msra.gmra.mxu0 %vm811_vm7, %v2106_v12  ;;  %2222 = vmatmul.mubr.msk.bf16.vlgmr.msra.gmra.mxu1 %vm811_vm7, %v2106_v12 }
 0x23f   : > { %1861 = vmatpush1.bf16.msra.mxu0 %v1838_v13  ;;  %2226 = vmatpush3.bf16.msra.mxu1 %v1844_v14 }
 0x240   : > { %1878 = vmatprep.mubr.bf16.mxu0 %v2369_v1  ;;  %2227 = vmatprep.mubr.msk.bf16.mxu1 %vm2370_vm0, %v2368_v0 }
 0x246   : > { %2115 = vmatmul.mubr.msk.bf16.vlgmr.msra.gmra.mxu0 %vm1832_vm15, %v1810_v15  ;;  %2228 = vmatmul.mubr.msk.bf16.vlgmr.msra.gmra.mxu1 %vm1832_vm15, %v1810_v15 }
 0x2be   : > { %v859_v16 = vpop.f32.mrf.mxu0  ;;  %v900_v17 = vpop.f32.mrf.mxu1 }
 0x2c0   : > { %v861_v18 = vpop.f32.mrf.mxu0  ;;  %v2175_v19 = vpop.f32.mrf.mxu1 }
 0x2c2   : > { %v863_v20 = vpop.f32.mrf.mxu0  ;;  %v903_v21 = vpop.f32.mrf.mxu1 }
 0x2c4   : > { %v864_v22 = vpop.f32.mrf.mxu0  ;;  %v2176_v23 = vpop.f32.mrf.mxu1 }
 0x2c6   : > { %v964_v24 = vpop.f32.mrf.mxu0  ;;  %v1005_v1 = vpop.f32.mrf.mxu1 }
 0x2c7   : > { %v965_v4 = vadd.f32 %v964_v24, %v859_v16  ;;  %v1006_v7 = vadd.f32 %v1005_v1, %v900_v17 }
 0x2c8   : > { %v966_v25 = vpop.f32.mrf.mxu0  ;;  %v2181_v26 = vpop.f32.mrf.mxu1 }
 0x2c9   : > { %v967_v11 = vadd.f32 %v966_v25, %v861_v18 }
 0x2ca   : > { %v968_v0 = vpop.f32.mrf.mxu0  ;;  %v1008_v27 = vpop.f32.mrf.mxu1 }
 0x2cc   : > { %v969_v28 = vpop.f32.mrf.mxu0  ;;  %v2182_v29 = vpop.f32.mrf.mxu1 }
 0x2ce   : > { %v1071_v30 = vpop.f32.mrf.mxu0  ;;  %v1112_v31 = vpop.f32.mrf.mxu1 }
 0x2cf   : > { %v1118_v8 = vadd.f32 %v1071_v30, %v965_v4  ;;  %v1120_v12 = vadd.f32 %v1112_v31, %v1006_v7 }
 0x2d0   : > { %v1073_v32 = vpop.f32.mrf.mxu0  ;;  %v2187_v33 = vpop.f32.mrf.mxu1 }
 0x2d1   : > { %v1119_v19 = vadd.f32 %v1073_v32, %v967_v11 }
 0x2d2   : > { %v1075_v34 = vpop.f32.mrf.mxu0  ;;  %v1115_v35 = vpop.f32.mrf.mxu1 }
 0x2d4   : > { %v1076_v36 = vpop.f32.mrf.mxu0  ;;  %v2188_v37 = vpop.f32.mrf.mxu1 }
 0x2d6   : > { %v1181_v38 = vpop.f32.mrf.mxu0  ;;  %v1222_v39 = vpop.f32.mrf.mxu1 }
 0x2d7   : > { %v1228_v13 = vadd.f32 %v1181_v38, %v1118_v8  ;;  %v1230_v20 = vadd.f32 %v1222_v39, %v1120_v12  ;;  %v1931_v39 = vpop.permute.xlu0 %1930 }
 0x2d8   : > { %v1183_v40 = vpop.f32.mrf.mxu0  ;;  %v2193_v41 = vpop.f32.mrf.mxu1 }
 0x2d9   : > { %v1229_v26 = vadd.f32 %v1183_v40, %v1119_v19  ;;  %v1794_v40 = vpop.permute.xlu1 %1793 }
 0x2da   : > { %v1185_v42 = vpop.f32.mrf.mxu0  ;;  %v1225_v43 = vpop.f32.mrf.mxu1 }
 0x2dc   : > { %v1186_v44 = vpop.f32.mrf.mxu0  ;;  %v2194_v45 = vpop.f32.mrf.mxu1 }
 0x2de   : > { %v1289_v46 = vpop.f32.mrf.mxu0  ;;  %v1330_v47 = vpop.f32.mrf.mxu1 }
 0x2df   : > { %v1336_v21 = vadd.f32 %v1289_v46, %v1228_v13  ;;  %v1338_v0 = vadd.f32 %v1330_v47, %v1230_v20 }
 0x2e0   : > { %v1291_v48 = vpop.f32.mrf.mxu0  ;;  %v2199_v49 = vpop.f32.mrf.mxu1 }
 0x2e1   : > { %v1337_v28 = vadd.f32 %v1291_v48, %v1229_v26 }
 0x2e2   : > { %v1293_v50 = vpop.f32.mrf.mxu0  ;;  %v1333_v51 = vpop.f32.mrf.mxu1 }
 0x2e4   : > { %v1294_v52 = vpop.f32.mrf.mxu0  ;;  %v2200_v53 = vpop.f32.mrf.mxu1 }
 0x2e5   : > { %v1940_v52 = vpop.permute.xlu0 %1939  ;;  %v1803_v53 = vpop.permute.xlu1 %1802 }
 0x2e6   : > { %v1410_v54 = vpop.f32.mrf.mxu0  ;;  %v1451_v55 = vpop.f32.mrf.mxu1 }
 0x2e7   : > { %v1457_v27 = vadd.f32 %v1410_v54, %v1336_v21  ;;  %v1459_v17 = vadd.f32 %v1451_v55, %v1338_v0 }
 0x2e8   : > { %v1412_v56 = vpop.f32.mrf.mxu0  ;;  %v2205_v57 = vpop.f32.mrf.mxu1 }
 0x2e9   : > { %v1458_v18 = vadd.f32 %v1412_v56, %v1337_v28 }
 0x2ea   : > { %v1414_v58 = vpop.f32.mrf.mxu0  ;;  %v1454_v59 = vpop.f32.mrf.mxu1 }
 0x2ec   : > { %v1415_v60 = vpop.f32.mrf.mxu0  ;;  %v2206_v61 = vpop.f32.mrf.mxu1 }
 0x2ee   : > { %v1520_v62 = vpop.f32.mrf.mxu0  ;;  %v1561_v63 = vpop.f32.mrf.mxu1 }
 0x2ef   : > { %v1567_v1 = vadd.f32 %v1520_v62, %v1457_v27  ;;  %v1569_v25 = vadd.f32 %v1561_v63, %v1459_v17 }
 0x2f0   : > { %v1522_v2 = vpop.f32.mrf.mxu0  ;;  %v2211_v3 = vpop.f32.mrf.mxu1 }
 0x2f1   : > { %v1568_v32 = vadd.f32 %v1522_v2, %v1458_v18 }
 0x2f2   : > { %v1524_v5 = vpop.f32.mrf.mxu0  ;;  %v1564_v6 = vpop.f32.mrf.mxu1 }
 0x2f4   : > { %v1525_v9 = vpop.f32.mrf.mxu0  ;;  %v2212_v10 = vpop.f32.mrf.mxu1 }
 0x2f6   : > { %v1630_v14 = vpop.f32.mrf.mxu0  ;;  %v1671_v15 = vpop.f32.mrf.mxu1 }
 0x2f7   : > { %v1677_v31 = vadd.f32 %v1630_v14, %v1567_v1  ;;  %v1679_v35 = vadd.f32 %v1671_v15, %v1569_v25 }
 0x2f8   : > { %v1632_v22 = vpop.f32.mrf.mxu0  ;;  %v2217_v23 = vpop.f32.mrf.mxu1 }
 0x2f9   : > { %v1678_v41 = vadd.f32 %v1632_v22, %v1568_v32 }
 0x2fa   : > { %v1634_v16 = vpop.f32.mrf.mxu0  ;;  %v1674_v24 = vpop.f32.mrf.mxu1 }
 0x2fc   : > { %v1635_v29 = vpop.f32.mrf.mxu0  ;;  %v2218_v30 = vpop.f32.mrf.mxu1 }
 0x2fe   : > { %v1740_v33 = vpop.f32.mrf.mxu0  ;;  %v1781_v34 = vpop.f32.mrf.mxu1 }
 0x2ff   : > { %v1787_v36 = vadd.f32 %v1740_v33, %v1677_v31  ;;  %v1789_v42 = vadd.f32 %v1781_v34, %v1679_v35 }
 0x300   : > { %v1742_v37 = vpop.f32.mrf.mxu0  ;;  %v2223_v38 = vpop.f32.mrf.mxu1 }
 0x301   : > { %v1788_v45 = vadd.f32 %v1742_v37, %v1678_v41  ;;  %v1796_v46 = vmul.f32 %v1794_v40, %v1787_v36  ;;  %v1798_v49 = vmul.f32 %v1794_v40, %v1789_v42 }
 0x302   : > { %v1744_v43 = vpop.f32.mrf.mxu0  ;;  %v1784_v44 = vpop.f32.mrf.mxu1 }
 0x303   : > { %v1797_v54 = vmul.f32 %v1794_v40, %v1788_v45  ;;  %v1805_v57 = vadd.f32 %v1803_v53, %v1796_v46  ;;  %v1807_v60 = vadd.f32 %v1803_v53, %v1798_v49 }
 0x304   : > { %v1745_v47 = vpop.f32.mrf.mxu0  ;;  %v2224_v48 = vpop.f32.mrf.mxu1 }
 0x305   : > { %v1806_v4 = vadd.f32 %v1803_v53, %v1797_v54 }
 0x306   : > { %v1880_v50 = vpop.f32.mrf.mxu0  ;;  %v1921_v51 = vpop.f32.mrf.mxu1 }
 0x307   : > { %v1933_v55 = vmul.f32 %v1931_v39, %v1880_v50  ;;  %v1935_v56 = vmul.f32 %v1931_v39, %v1921_v51 }
 0x308   : > { %v1882_v58 = vpop.f32.mrf.mxu0  ;;  %v2229_v59 = vpop.f32.mrf.mxu1 }
 0x309   : > { %v1942_v61 = vadd.f32 %v1940_v52, %v1933_v55  ;;  %v1944_v62 = vadd.f32 %v1940_v52, %v1935_v56  ;;  %v1934_v63 = vmul.f32 %v1931_v39, %v1882_v58 }
 0x30a   : > { %v1884_v2 = vpop.f32.mrf.mxu0  ;;  %v1924_v3 = vpop.f32.mrf.mxu1 }
 0x30b   : > { %v1945_v5 = vadd.f32 %v1942_v61, %v1805_v57  ;;  %v1947_v6 = vadd.f32 %v1944_v62, %v1807_v60  ;;  %v1943_v7 = vadd.f32 %v1940_v52, %v1934_v63 }
 0x30c   : > { %v1885_v8 = vpop.f32.mrf.mxu0  ;;  %v2230_v9 = vpop.f32.mrf.mxu1 }
 0x30d   : > { %v1950_v10 = vmax.f32 %v1947_v6, 0.0  ;;  %v1946_v11 = vadd.f32 %v1943_v7, %v1806_v4  ;;  %v1948_v12 = vmax.f32 %v1945_v5, 0.0 }
 0x30f   : > { %v2126_v13 = vpack.c.bf16 %v1950_v10, %v1950_v10  ;;  %v1949_v14 = vmax.f32 %v1946_v11, 0.0 }
 0x311   : > { %v2125_v15 = vpack.c.bf16 %v1949_v14, %v1948_v12  ;;  %1965 = vst [vmem:[%s379_s30 + $0x8] sm:$0xf] %v2126_v13 }
 0x313   : > { %1964 = vst [vmem:[%s379_s30] sm:$0xff] %v2125_v15 }
 0x314   : > { %2319 = shalt.err (!%p2316_p3)
}
 0x315   : > { %s2320_s13 = scalar_lea.hbm %s1979_s16, 192  ;;  %s2324_s30 = scalar_lea.hbm %s2772_s11, 384 }
 0x316   : > { %p2321_p4 = scmp.ne.s32.totalorder %s1979_s16, %s2320_s13  ;;  %p2325_p9 = scmp.lt.s32.totalorder %s1979_s16, %s2772_s11 }
 0x317   : > { %p2326_p10 = scmp.lt.s32.totalorder %s2324_s30, %s2320_s13 }
 0x318   : > { %p2322_p7 = pnand %p2321_p4, %p2479_p5 }
 0x319   : > { %p2327_p11 = por %p2326_p10, %p2325_p9 }
 0x31a   : > { %p2323_p8 = pneg %p2322_p7 }
 0x31c   : > { %p2328_p12 = pnand %p2327_p11, %p2323_p8 }
 0x31e   : > { %2331 = shalt.err (!%p2328_p12)
}
 0x31f   : > { %2233 = dma.vmem_to_hbm [thread:$0]  (%p2479_p5), %s1982_s12, 192, %s1979_s16, %s1967_s22  }
 0x320 PF: > { %p2239_p13 = scmp.ge.s32.totalorder %s2366_s20, 2  ;;  %s1993_s0 = sand.u32 1, %s2354_s17  }
 0x321   : > { %s1994_s24 = scalar_lea.sflag [#allocation4], %s1993_s0 }
 0x322   : > { %p2236_p0 = pnand %p2239_p13, %p2483_p6 }
 0x324   : > { %p2237_p1 = pneg %p2236_p0 }
 0x326   : > { %2349 = dma.done.wait (%p2237_p1), %s1994_s24, 192  }
 0x327   : > { %2351 = vsyncadd (%p2237_p1), %s1994_s24, 4294967104  ;;  %p21_p2 = scmp.ge.s32.totalorder %s2466_s23, 4   ;;  %s2779_s17 = smov %s2358_s18 }
 0x328   : > { %s2780_s18 = smov %s2362_s19  ;;  %s2781_s19 = smov %s2477_s26 }
 0x329   : > { %s2782_s20 = smov %s2466_s23  ;;  %23 = sbr.rel (!%p21_p2) target bundleno = 6 (0x6), region = 109 }
 0x32e   :  { %1999 = vsyncpa [#allocation4], 1 }
 0x32f   :  { %2001 = vsyncpa [#allocation4 + $0x1], 1 }

</bundles_post_ra>
